<compile_context>
chip_gen: v7x
topology: tpu7x:2x2x1
jax: 0.10.0
libtpu: 0.0.40
codegen_flags: <defaults>
</compile_context>

<pallas_src>
import functools
import math

import jax
import jax.numpy as jnp
from jax import lax
from jax.experimental import pallas as pl
from jax.experimental.pallas import tpu as pltpu


def _flash_attention_kernel(q_ref, k_ref, v_ref, o_ref,
                            m_sc, l_sc, acc_sc, qs_sc,
                            *, scale_log2e, kv_len, kv_tile,
                            needs_kv_mask, fuse_denom, denom_col, compute_dtype):
    # q_ref: (G, tq, Dk)  k_ref: (G, tkv, Dk)  v_ref: (G, tkv, Dv_p)
    kv_idx = pl.program_id(2)

    @pl.when(kv_idx == 0)
    def _init():
        m_sc[...] = jnp.full(m_sc.shape, -jnp.inf, m_sc.dtype)
        acc_sc[...] = jnp.zeros(acc_sc.shape, acc_sc.dtype)
        # Fold scale*log2(e) into Q once per Q block; reuse from VMEM every KV step.
        qs_sc[...] = (q_ref[...] * scale_log2e).astype(qs_sc.dtype)
        if not fuse_denom:
            l_sc[...] = jnp.zeros(l_sc.shape, l_sc.dtype)

    q = qs_sc[...]
    k = k_ref[...].astype(compute_dtype)

    # Batched QK^T contracting the depth dims directly (no K transpose on the XLU).
    s = lax.dot_general(
        q, k,
        dimension_numbers=(((2,), (2,)), ((0,), (0,))),
        preferred_element_type=jnp.float32)          # (G, tq, tkv), base-2 logits

    if needs_kv_mask:
        # Only the last KV block can contain padded columns.  Gate the mask with the
        # scalar predicate so earlier blocks pay only one select, and build the
        # column ids from a (1,1,tkv) iota (not a full (G,tq,tkv) one).
        is_pad_block = (kv_idx + 1) * kv_tile > kv_len
        col = kv_idx * kv_tile + lax.broadcasted_iota(jnp.int32, (1, 1, kv_tile), 2)
        keep = jnp.logical_or(col < kv_len, jnp.logical_not(is_pad_block))
        s = jnp.where(keep, s, -1e30)                # finite: no -inf - -inf NaN

    m_prev = m_sc[...]
    m_new = jnp.maximum(m_prev, jnp.max(s, axis=-1, keepdims=True))
    alpha = jnp.exp2(m_prev - m_new)
    p = jnp.exp2(s - m_new)

    # P @ V (batched, f32 accumulation on the MXU).  With the fused denominator the
    # ones-column of V makes acc[..., denom_col] the running softmax denominator.
    pv = lax.dot_general(
        p.astype(compute_dtype), v_ref[...].astype(compute_dtype),
        dimension_numbers=(((2,), (1,)), ((0,), (0,))),
        preferred_element_type=jnp.float32)          # (G, tq, Dv_p)

    acc_sc[...] = alpha * acc_sc[...] + pv
    m_sc[...] = m_new
    if not fuse_denom:
        l_sc[...] = alpha * l_sc[...] + jnp.sum(p, axis=-1, keepdims=True)

    @pl.when(kv_idx == pl.num_programs(2) - 1)
    def _finalize():
        acc = acc_sc[...]
        if fuse_denom:
            l = acc_sc[:, :, denom_col:denom_col + 1]
        else:
            l = l_sc[...]
        inv = pl.reciprocal(l, approx=True)          # EUP vrcp, ~free
        o_ref[...] = (acc * inv).astype(o_ref.dtype)


def _round_up(x, m):
    return ((x + m - 1) // m) * m


def _pick_head_group(bh, tq, n_q_blocks, target_rows=512):
    """Largest divisor G of bh with G*tq <= target_rows, preferring an even number
    of parallel grid blocks (v7x has 2 TensorCores splitting the parallel axes)."""
    g_max = max(1, target_rows // max(tq, 1))
    divisors = [d for d in range(1, min(g_max, bh) + 1) if bh % d == 0]

    def score(d):
        n_parallel = (bh // d) * n_q_blocks
        balanced = (n_parallel % 2 == 0) and (n_parallel >= 2)
        return (balanced, d)

    return max(divisors, key=score)


def _cap_kv_tile(tkv, *, g, tq, dk, dv_p, itemsize, budget_bytes):
    """Shrink the KV tile until the rough VMEM working set fits the budget."""
    def estimate(t):
        io_blocks = 2 * g * (tq * dk + t * dk + t * dv_p + tq * dv_p) * itemsize
        scratch = g * tq * (dv_p + dk + 2) * 4
        interm = 3 * g * tq * t * 4          # s / p / exp temporaries (f32)
        return io_blocks + scratch + interm

    while tkv > 512 and estimate(tkv) > budget_bytes:
        tkv = max(512, _round_up(tkv // 2, 8))
    return tkv


def attention(queries, keys, values, *, q_tile=256, kv_tile=1024,
              matmul_dtype=None, vmem_limit_bytes=48 * 1024 * 1024):
    """queries [B,H,Lq,Dk], keys [B,H,Lkv,Dk], values [B,H,Lkv,Dv]
    -> [B*H, Lq, Dv], matching the PyTorch module's forward."""
    b, h, lq, dk = queries.shape
    _, _, lkv, _ = keys.shape
    dv = values.shape[-1]
    bh = b * h

    compute_dtype = jnp.dtype(matmul_dtype) if matmul_dtype is not None \
        else jnp.dtype(queries.dtype)
    itemsize = jnp.dtype(queries.dtype).itemsize
    scale_log2e = math.log2(math.e) / math.sqrt(dk)

    q = queries.reshape(bh, lq, dk)
    k = keys.reshape(bh, lkv, dk)
    v = values.reshape(bh, lkv, dv)

    # Fuse the softmax denominator into PV when dv padding leaves spare lanes
    # (dv % 128 != 0): a ones-column rides in the padded region of V for free.
    fuse_denom = (dv % 128) != 0
    dv_p = _round_up(dv, 128) if fuse_denom else dv
    denom_col = dv

    # Tile sizes (sublane granule 8); large KV tiles, VMEM-budgeted.
    tq = min(q_tile, _round_up(lq, 8))
    lq_p = _round_up(lq, tq)
    n_q_blocks = lq_p // tq
    g = _pick_head_group(bh, tq, n_q_blocks)

    tkv = min(kv_tile, _round_up(lkv, 8))
    tkv = _cap_kv_tile(tkv, g=g, tq=tq, dk=dk, dv_p=dv_p, itemsize=itemsize,
                       budget_bytes=int(0.75 * vmem_limit_bytes))
    lkv_p = _round_up(lkv, tkv)
    needs_kv_mask = (not fuse_denom) and (lkv_p != lkv)

    # Pad only what is actually needed (no depth padding for Q/K).
    if lq_p != lq:
        q = jnp.pad(q, ((0, 0), (0, lq_p - lq), (0, 0)))
    if lkv_p != lkv:
        k = jnp.pad(k, ((0, 0), (0, lkv_p - lkv), (0, 0)))
    if fuse_denom:
        v = jnp.pad(v, ((0, 0), (0, lkv_p - lkv), (0, dv_p - dv)))
        valid = (jnp.arange(lkv_p) < lkv).astype(v.dtype)   # 0 for padded KV rows
        v = v.at[:, :, denom_col].set(valid[None, :])
    elif lkv_p != lkv:
        v = jnp.pad(v, ((0, 0), (0, lkv_p - lkv), (0, 0)))

    grid = (bh // g, n_q_blocks, lkv_p // tkv)

    kernel = functools.partial(
        _flash_attention_kernel,
        scale_log2e=scale_log2e, kv_len=lkv, kv_tile=tkv,
        needs_kv_mask=needs_kv_mask, fuse_denom=fuse_denom,
        denom_col=denom_col, compute_dtype=compute_dtype)

    out_p = pl.pallas_call(
        kernel,
        out_shape=jax.ShapeDtypeStruct((bh, lq_p, dv_p), queries.dtype),
        grid_spec=pltpu.PrefetchScalarGridSpec(
            num_scalar_prefetch=0,
            grid=grid,
            in_specs=[
                pl.BlockSpec((g, tq, dk), lambda i, qi, ki: (i, qi, 0)),
                pl.BlockSpec((g, tkv, dk), lambda i, qi, ki: (i, ki, 0)),
                pl.BlockSpec((g, tkv, dv_p), lambda i, qi, ki: (i, ki, 0)),
            ],
            out_specs=pl.BlockSpec((g, tq, dv_p), lambda i, qi, ki: (i, qi, 0)),
            scratch_shapes=[
                pltpu.VMEM((g, tq, 1), jnp.float32),        # running max m (base-2)
                pltpu.VMEM((g, tq, 1), jnp.float32),        # running denom (fallback)
                pltpu.VMEM((g, tq, dv_p), jnp.float32),     # f32 accumulator
                pltpu.VMEM((g, tq, dk), compute_dtype),     # cached scaled Q
            ],
        ),
        compiler_params=pltpu.CompilerParams(
            dimension_semantics=("parallel", "parallel", "arbitrary"),
            vmem_limit_bytes=vmem_limit_bytes),
    )(q, k, v)

    if lq_p != lq or dv_p != dv:
        out_p = out_p[:, :lq, :dv]
    return out_p


def _reference(queries, keys, values):
    b, h, lq, dk = queries.shape
    lkv = keys.shape[2]
    dv = values.shape[-1]
    q = queries.reshape(-1, lq, dk).astype(jnp.float32)
    k = keys.reshape(-1, lkv, dk).astype(jnp.float32)
    v = values.reshape(-1, lkv, dv).astype(jnp.float32)
    s = jnp.einsum("bqd,bkd->bqk", q, k) / math.sqrt(dk)
    p = jax.nn.softmax(s, axis=-1)
    return jnp.einsum("bqk,bkd->bqd", p, v)


if __name__ == "__main__":
    root = jax.random.PRNGKey(0)

    # Case 1: shapes consistent with the module defaults (depth_qk = depth_v = 64).
    batch, heads, lq, lkv, dqk, dvv = 2, 3, 8, 8, 64, 64
    kq, kk, kv = jax.random.split(jax.random.fold_in(root, 1), 3)
    queries = jax.random.normal(kq, (batch, heads, lq, dqk), dtype=jnp.float32)
    keys = jax.random.normal(kk, (batch, heads, lkv, dqk), dtype=jnp.float32)
    values = jax.random.normal(kv, (batch, heads, lkv, dvv), dtype=jnp.float32)

    out = attention(queries, keys, values)
    jax.block_until_ready(out)
    ref = _reference(queries, keys, values)
    assert out.shape == (batch * heads, lq, dvv), out.shape
    assert jnp.allclose(out, ref, atol=3e-3, rtol=3e-3), \
        float(jnp.max(jnp.abs(out - ref)))

    # Case 2: ragged shapes exercising Lq/Lkv padding and the fused-denominator
    # ones-column with non-aligned depths.
    batch, heads, lq, lkv, dqk, dvv = 2, 3, 10, 20, 48, 40
    kq, kk, kv = jax.random.split(jax.random.fold_in(root, 2), 3)
    queries = jax.random.normal(kq, (batch, heads, lq, dqk), dtype=jnp.float32)
    keys = jax.random.normal(kk, (batch, heads, lkv, dqk), dtype=jnp.float32)
    values = jax.random.normal(kv, (batch, heads, lkv, dvv), dtype=jnp.float32)

    out = attention(queries, keys, values)
    jax.block_until_ready(out)
    ref = _reference(queries, keys, values)
    assert out.shape == (batch * heads, lq, dvv), out.shape
    assert jnp.allclose(out, ref, atol=3e-3, rtol=3e-3), \
        float(jnp.max(jnp.abs(out - ref)))

    print("KERNEL_OK")
</pallas_src>

<mosaic_0001>
module attributes {stable_mosaic.version = 11 : i64} {
  func.func @_flash_attention_kernel(%arg0: i32, %arg1: i32, %arg2: i32, %arg3: memref<3x8x64xf32, #tpu.memory_space<vmem>>, %arg4: memref<3x8x64xf32, #tpu.memory_space<vmem>>, %arg5: memref<3x8x128xf32, #tpu.memory_space<vmem>>, %arg6: memref<3x8x128xf32, #tpu.memory_space<vmem>>, %arg7: memref<3x8x1xf32, #tpu.memory_space<vmem>>, %arg8: memref<3x8x1xf32, #tpu.memory_space<vmem>>, %arg9: memref<3x8x128xf32, #tpu.memory_space<vmem>>, %arg10: memref<3x8x64xf32, #tpu.memory_space<vmem>>) attributes {dimension_semantics = [#tpu.dimension_semantics<parallel>, #tpu.dimension_semantics<parallel>, #tpu.dimension_semantics<arbitrary>], iteration_bounds = array<i64: 2, 1, 1>, scalar_prefetch = 0 : i64, scratch_operands = 4 : i64, tpu.core_type = #tpu.core_type<tc>, window_params = [{transform_indices = @transform_0, window_bounds = array<i64: 3, 8, 64>}, {transform_indices = @transform_1, window_bounds = array<i64: 3, 8, 64>}, {transform_indices = @transform_2, window_bounds = array<i64: 3, 8, 128>}, {transform_indices = @transform_3, window_bounds = array<i64: 3, 8, 128>}]} {
    %c0_i32 = arith.constant 0 : i32
    %0 = arith.cmpi eq, %arg2, %c0_i32 : i32
    %1 = arith.extui %0 : i1 to i32
    %c0_i32_0 = arith.constant 0 : i32
    %2 = arith.cmpi ne, %1, %c0_i32_0 : i32
    scf.if %2 {
      %cst_25 = arith.constant 0xFF800000 : f32
      %26 = vector.broadcast %cst_25 : f32 to vector<3x8x1xf32>
      %c0_26 = arith.constant 0 : index
      %c0_27 = arith.constant 0 : index
      %c0_28 = arith.constant 0 : index
      %27 = vector.load %arg7[%c0_26, %c0_27, %c0_28] : memref<3x8x1xf32, #tpu.memory_space<vmem>>, vector<3x8x1xf32>
      tpu.vector_store %arg7[%c0_26, %c0_27, %c0_28], %26 {strides = array<i32>} : memref<3x8x1xf32, #tpu.memory_space<vmem>>, vector<3x8x1xf32>,
      %cst_29 = arith.constant 0.000000e+00 : f32
      %28 = vector.broadcast %cst_29 : f32 to vector<3x8x128xf32>
      %c0_30 = arith.constant 0 : index
      %c0_31 = arith.constant 0 : index
      %c0_32 = arith.constant 0 : index
      %29 = vector.load %arg9[%c0_30, %c0_31, %c0_32] : memref<3x8x128xf32, #tpu.memory_space<vmem>>, vector<3x8x128xf32>
      tpu.vector_store %arg9[%c0_30, %c0_31, %c0_32], %28 {strides = array<i32>} : memref<3x8x128xf32, #tpu.memory_space<vmem>>, vector<3x8x128xf32>,
      %c0_33 = arith.constant 0 : index
      %c0_34 = arith.constant 0 : index
      %c0_35 = arith.constant 0 : index
      %30 = vector.load %arg3[%c0_33, %c0_34, %c0_35] : memref<3x8x64xf32, #tpu.memory_space<vmem>>, vector<3x8x64xf32>
      %cst_36 = arith.constant 0.180336878 : f32
      %31 = vector.broadcast %cst_36 : f32 to vector<3x8x64xf32>
      %32 = arith.mulf %30, %31 : vector<3x8x64xf32>
      %c0_37 = arith.constant 0 : index
      %c0_38 = arith.constant 0 : index
      %c0_39 = arith.constant 0 : index
      %33 = vector.load %arg10[%c0_37, %c0_38, %c0_39] : memref<3x8x64xf32, #tpu.memory_space<vmem>>, vector<3x8x64xf32>
      tpu.vector_store %arg10[%c0_37, %c0_38, %c0_39], %32 {strides = array<i32>} : memref<3x8x64xf32, #tpu.memory_space<vmem>>, vector<3x8x64xf32>,
    } else {
    }
    %c0 = arith.constant 0 : index
    %c0_1 = arith.constant 0 : index
    %c0_2 = arith.constant 0 : index
    %3 = vector.load %arg10[%c0, %c0_1, %c0_2] : memref<3x8x64xf32, #tpu.memory_space<vmem>>, vector<3x8x64xf32>
    %c0_3 = arith.constant 0 : index
    %c0_4 = arith.constant 0 : index
    %c0_5 = arith.constant 0 : index
    %4 = vector.load %arg4[%c0_3, %c0_4, %c0_5] : memref<3x8x64xf32, #tpu.memory_space<vmem>>, vector<3x8x64xf32>
    %cst = arith.constant dense<0.000000e+00> : vector<3x8x8xf32>
    %5 = tpu.matmul %3, %4, %cst {dimension_numbers = #tpu.dot_dimension_numbers<[2], [2], [1], [1], [0, 0, 0, 1, 1, 1], [0], [0]>} : vector<3x8x64xf32>, vector<3x8x64xf32>, vector<3x8x8xf32> -> vector<3x8x8xf32>
    %c0_6 = arith.constant 0 : index
    %c0_7 = arith.constant 0 : index
    %c0_8 = arith.constant 0 : index
    %6 = vector.load %arg7[%c0_6, %c0_7, %c0_8] : memref<3x8x1xf32, #tpu.memory_space<vmem>>, vector<3x8x1xf32>
    %cst_9 = arith.constant dense<0xFF800000> : vector<3x8xf32>
    %7 = vector.multi_reduction <maximumf>, %5, %cst_9 [2] : vector<3x8x8xf32> to vector<3x8xf32>
    %8 = vector.shape_cast %7 : vector<3x8xf32> to vector<3x8x1xf32>
    %9 = arith.maximumf %6, %8 : vector<3x8x1xf32>
    %10 = arith.subf %6, %9 : vector<3x8x1xf32>
    %11 = math.exp2 %10 : vector<3x8x1xf32>
    %12 = vector.broadcast %9 : vector<3x8x1xf32> to vector<3x8x8xf32>
    %13 = arith.subf %5, %12 : vector<3x8x8xf32>
    %14 = math.exp2 %13 : vector<3x8x8xf32>
    %c0_10 = arith.constant 0 : index
    %c0_11 = arith.constant 0 : index
    %c0_12 = arith.constant 0 : index
    %15 = vector.load %arg5[%c0_10, %c0_11, %c0_12] : memref<3x8x128xf32, #tpu.memory_space<vmem>>, vector<3x8x128xf32>
    %cst_13 = arith.constant dense<0.000000e+00> : vector<3x8x128xf32>
    %16 = tpu.matmul %14, %15, %cst_13 {dimension_numbers = #tpu.dot_dimension_numbers<[2], [1], [1], [2], [0, 0, 0, 1, 1, 2], [0], [0]>} : vector<3x8x8xf32>, vector<3x8x128xf32>, vector<3x8x128xf32> -> vector<3x8x128xf32>
    %c0_14 = arith.constant 0 : index
    %c0_15 = arith.constant 0 : index
    %c0_16 = arith.constant 0 : index
    %17 = vector.load %arg9[%c0_14, %c0_15, %c0_16] : memref<3x8x128xf32, #tpu.memory_space<vmem>>, vector<3x8x128xf32>
    %18 = vector.broadcast %11 : vector<3x8x1xf32> to vector<3x8x128xf32>
    %19 = arith.mulf %18, %17 : vector<3x8x128xf32>
    %20 = arith.addf %19, %16 : vector<3x8x128xf32>
    %c0_17 = arith.constant 0 : index
    %c0_18 = arith.constant 0 : index
    %c0_19 = arith.constant 0 : index
    %21 = vector.load %arg9[%c0_17, %c0_18, %c0_19] : memref<3x8x128xf32, #tpu.memory_space<vmem>>, vector<3x8x128xf32>
    tpu.vector_store %arg9[%c0_17, %c0_18, %c0_19], %20 {strides = array<i32>} : memref<3x8x128xf32, #tpu.memory_space<vmem>>, vector<3x8x128xf32>,
    %c0_20 = arith.constant 0 : index
    %c0_21 = arith.constant 0 : index
    %c0_22 = arith.constant 0 : index
    %22 = vector.load %arg7[%c0_20, %c0_21, %c0_22] : memref<3x8x1xf32, #tpu.memory_space<vmem>>, vector<3x8x1xf32>
    tpu.vector_store %arg7[%c0_20, %c0_21, %c0_22], %9 {strides = array<i32>} : memref<3x8x1xf32, #tpu.memory_space<vmem>>, vector<3x8x1xf32>,
    %c0_i32_23 = arith.constant 0 : i32
    %23 = arith.cmpi eq, %arg2, %c0_i32_23 : i32
    %24 = arith.extui %23 : i1 to i32
    %c0_i32_24 = arith.constant 0 : i32
    %25 = arith.cmpi ne, %24, %c0_i32_24 : i32
    scf.if %25 {
      %c0_25 = arith.constant 0 : index
      %c0_26 = arith.constant 0 : index
      %c0_27 = arith.constant 0 : index
      %26 = vector.load %arg9[%c0_25, %c0_26, %c0_27] : memref<3x8x128xf32, #tpu.memory_space<vmem>>, vector<3x8x128xf32>
      %c0_28 = arith.constant 0 : index
      %c0_29 = arith.constant 0 : index
      %c64 = arith.constant 64 : index
      %27 = vector.load %arg9[%c0_28, %c0_29, %c64] : memref<3x8x128xf32, #tpu.memory_space<vmem>>, vector<3x8x1xf32>
      %28 = tpu.reciprocal %27 {approx = true} : vector<3x8x1xf32> -> vector<3x8x1xf32>
      %29 = vector.broadcast %28 : vector<3x8x1xf32> to vector<3x8x128xf32>
      %30 = arith.mulf %26, %29 : vector<3x8x128xf32>
      %c0_30 = arith.constant 0 : index
      %c0_31 = arith.constant 0 : index
      %c0_32 = arith.constant 0 : index
      %31 = vector.load %arg6[%c0_30, %c0_31, %c0_32] : memref<3x8x128xf32, #tpu.memory_space<vmem>>, vector<3x8x128xf32>
      tpu.vector_store %arg6[%c0_30, %c0_31, %c0_32], %30 {strides = array<i32>} : memref<3x8x128xf32, #tpu.memory_space<vmem>>, vector<3x8x128xf32>,
    } else {
    }
    return
  }
  func.func @transform_0(%arg0: i32, %arg1: i32, %arg2: i32) -> (i32, i32, i32) {
    %c0_i32 = arith.constant 0 : i32
    %c0_i32_0 = arith.constant 0 : i32
    return %arg0, %arg1, %c0_i32 : i32, i32, i32
  }
  func.func @transform_1(%arg0: i32, %arg1: i32, %arg2: i32) -> (i32, i32, i32) {
    %c0_i32 = arith.constant 0 : i32
    %c0_i32_0 = arith.constant 0 : i32
    return %arg0, %arg2, %c0_i32 : i32, i32, i32
  }
  func.func @transform_2(%arg0: i32, %arg1: i32, %arg2: i32) -> (i32, i32, i32) {
    %c0_i32 = arith.constant 0 : i32
    %c0_i32_0 = arith.constant 0 : i32
    return %arg0, %arg2, %c0_i32 : i32, i32, i32
  }
  func.func @transform_3(%arg0: i32, %arg1: i32, %arg2: i32) -> (i32, i32, i32) {
    %c0_i32 = arith.constant 0 : i32
    %c0_i32_0 = arith.constant 0 : i32
    return %arg0, %arg1, %c0_i32 : i32, i32, i32
  }
}

</mosaic_0001>

<bundles_post_ra>
// kernel: tpu_custom_call.1
= control target key start
LH: loop header
LB: loop body
LE: loop exit
PB: predicated region body
PF: predicated region fallthrough
CT: control target
= control target key end

     0   :  { %s1739_s0 = inlined_call_operand.hbm [shape: f32[6,8,64], index: 0, kind: input, shape index: {}]   ;;  %s1740_s1 = inlined_call_operand.hbm [shape: f32[6,8,64], index: 1, kind: input, shape index: {}]   ;;  %s1741_s2 = inlined_call_operand.hbm [shape: f32[6,8,128], index: 2, kind: input, shape index: {}]   ;;  %s1742_s3 = inlined_call_operand.hbm [shape: f32[6,8,128], index: 3, kind: output, shape index: {}]  }
   0x1   :  { %1752 = sst [smem:[#allocation19_spill]] %s1740_s1 }
   0x2   :  { %8 = vsyncpa [#allocation7], 0 }
   0x3   :  { %10 = vsyncpa [#allocation7 + $0x1], 0 }
   0x4   :  { %11 = vsyncpa [#allocation10], 0 }
   0x5   :  { %13 = vsyncpa [#allocation10 + $0x1], 0 }
   0x6   :  { %14 = vsyncpa [#allocation8], 0 }
   0x7   :  { %16 = vsyncpa [#allocation8 + $0x1], 0  ;;  %s1416_s12 = smov 0   ;;  %s1418_s13 = smov 0  }
   0x8   :  { %s1420_s14 = smov 0   ;;  %s1422_s15 = smov 0  }
   0x9   :  { %s1424_s16 = smov 0   ;;  %s1426_s17 = smov 0  }
   0xa LB: > { %1753 = sst [smem:[#allocation16_spill]] %s1377_s16  ;;  %s1447_s18 = sadd.s32 4294967295, %s1381_s17   ;;  %s1381_s17 = sphi %s1426_s17, %s22_s17   ;;  %s1377_s16 = sphi %s1424_s16, %s1776_s16   ;;  %s1373_s15 = sphi %s1422_s15, %s1775_s15   ;;  %s1369_s14 = sphi %s1420_s14, %s1779_s14   ;;  %s1365_s13 = sphi %s1418_s13, %s1778_s13   ;;  %s1361_s12 = sphi %s1416_s12, %s1777_s12  }
   0xb   : > { %s1033_s19 = sadd.s32 4294967294, %s1381_s17   ;;  %s41_s20 = sadd.s32 1, %s1377_s16 }
   0xc   : > { %s50_s21 = sadd.s32 1, %s1369_s14  ;;  %p43_p0 = scmp.ge.s32.totalorder %s41_s20, 2 }
   0xd   : > { %p57_p1 = scmp.ne.s32.totalorder %s1369_s14, %s1365_s13  ;;  %p58_p2 = scmp.eq.s32.totalorder %s1381_s17, 0 }
   0xe   : > { %p63_p3 = scmp.ne.s32.totalorder %s1365_s13, %s1361_s12  ;;  %s1781_s20 = smov (%p43_p0, %s41_s20), 0 }
   0xf   : > { %1754 = sst [smem:[#allocation17_spill]] %s1781_s20  ;;  %p1459_p4 = por %p58_p2, %p57_p1 }
  0x10   : > { %p64_p5 = scmp.eq.s32.totalorder %s1447_s18, 0  ;;  %s45_s23 = ssub.s32 %s1377_s16, %s1781_s20 }
  0x11   : > { %p145_p6 = scmp.eq.s32.totalorder %s1447_s18, 1  ;;  %p48_p7 = scmp.eq.s32.totalorder %s45_s23, 0 }
  0x12   : > { %p1467_p8 = por %p64_p5, %p63_p3  ;;  %p151_p10 = scmp.eq.s32.totalorder %s1033_s19, 1 }
  0x13   : > { %p1471_p9 = por %p145_p6, %p57_p1  ;;  %p1124_p13 = scmp.lt.s32.totalorder %s1381_s17, 2 }
  0x14   : > { %s1756_s24 = scalar_select %p1467_p8, 1, 0 }
  0x15   : > { %s1757_s25 = scalar_select %p1471_p9, 1, 0 }
  0x16   : > { %s1476_s26 = scalar_select %p48_p7, %s1369_s14, %s50_s21  }
  0x17   : > { %p1478_p11 = por %p151_p10, %p63_p3  ;;  %s1745_s28 = sand.u32 1, %s1369_s14  }
  0x18   : > { %1758 = sst [smem:[#allocation18_spill]] %s1476_s26  ;;  %s1487_s29 = smul.u32 24, %s1745_s28 }
  0x19   : > { %s1759_s27 = scalar_select %p1478_p11, 1, 0 }
  0x1a   : > { %s1490_s30 = smul.u32 384, %s1377_s16  ;;  %p1494_p0 = pnand %p1124_p13, %p1459_p4 }
  0x1b   : > { %s193_s5 = sand.u32 1, %s1381_s17   ;;  %s1761_s1 = sld [smem:[#allocation19_spill]] }
  0x1c   : > { %s197_s9 = scalar_lea.vmem [#allocation9], %s1487_s29  ;;  %s1510_s11 = scalar_lea.sflag [#allocation10], %s193_s5 }
  0x1d   : > { %s205_s10 = sshll.u32 %s197_s9, 4  ;;  %p1516_p4 = pneg %p1494_p0  ;;  %s1507_s10 = int_to_ptr.vmem [resolvable:$true] %s205_s10 }
  0x21   : > { %s1503_s8 = scalar_lea.hbm %s1761_s1, %s1490_s30  ;;  %s1210_s6 = scalar_lea.hbm %s1761_s1, 768 }
  0x22   : > { %s1205_s19 = scalar_lea.hbm %s1503_s8, 384  ;;  %p1211_p7 = scmp.lt.u32.totalorder %s1503_s8, %s1761_s1 }
  0x23   : > { %p1206_p3 = scmp.ne.s32.totalorder %s1503_s8, %s1205_s19  ;;  %p1212_p10 = scmp.lt.u32.totalorder %s1210_s6, %s1205_s19 }
  0x24   : > { %p1214_p12 = scmp.lt.u32.totalorder %s1205_s19, %s1503_s8 }
  0x25   : > { %p1208_p5 = pnand %p1516_p4, %p1206_p3  ;;  %p1213_p13 = por %p1212_p10, %p1211_p7 }
  0x27   : > { %p1209_p6 = pneg %p1208_p5  ;;  %p1215_p1 = por %p1214_p12, %p1213_p13 }
  0x29   : > { %p1216_p2 = pnand %p1215_p1, %p1209_p6 }
  0x2b   : > { %1219 = shalt.err (!%p1216_p2)
}
  0x2c   : > { %s1220_s5 = scalar_lea.vmem %s1507_s10, 384  ;;  %s1383_s22 = smov [#allocation9]  }
  0x2d   : > { %p1221_p3 = scmp.ne.s32.totalorder %s1507_s10, %s1220_s5  ;;  %s1225_s23 = sshll.u32 %s1383_s22, 4  ;;  %s1226_s23 = int_to_ptr.vmem [resolvable:$false] %s1225_s23 }
  0x2e   : > { %s1227_s7 = scalar_lea.vmem %s1226_s23, 768  ;;  %p1228_p9 = scmp.lt.s32.totalorder %s1507_s10, %s1226_s23 }
  0x2f   : > { %p1223_p5 = pnand %p1221_p3, %p1516_p4  ;;  %p1229_p8 = scmp.lt.s32.totalorder %s1227_s7, %s1220_s5 }
  0x31   : > { %p1224_p11 = pneg %p1223_p5  ;;  %p1230_p7 = por %p1229_p8, %p1228_p9 }
  0x33   : > { %p1231_p10 = pnand %p1230_p7, %p1224_p11 }
  0x35   : > { %1234 = shalt.err (!%p1231_p10)
}
  0x36   : > { %s1746_s19 = smov 128   ;;  %s1748_s6 = smov 8  }
  0x37   : > { %1116 = dma.hbm_to_vmem [thread:$0]  (!%p1494_p0), %s1503_s8, 384, %s1507_s10, %s1510_s11, %s1746_s19, %s1746_s19, %s1748_s6  }
  0x38   : > { %p1763_p8 = scmp.lt.s32.totalorder %s1381_s17, 3  ;;  %p1764_p9 = scmp.ge.s32.totalorder %s1381_s17, 1 }
  0x39   : > { %s1555_s23 = scalar_lea.hbm %s1739_s0, %s1490_s30  ;;  %s175_s7 = scalar_lea.vmem [#allocation6], %s1487_s29 }
  0x3a   : > { %p1547_p11 = pnand %p1764_p9, %p1763_p8  ;;  %s183_s28 = sshll.u32 %s175_s7, 4  ;;  %s1558_s28 = int_to_ptr.vmem [resolvable:$true] %s183_s28 }
  0x3b   : > { %s1564_s19 = scalar_lea.hbm %s1741_s2, %s1490_s30  ;;  %s1766_s6 = sand.u32 1, %s1369_s14  }
  0x3c   : > { %s1765_s9 = scalar_select %p1547_p11, 1, 0 }
  0x3d   : > { %s1568_s1 = scalar_lea.sflag [#allocation7], %s1766_s6  ;;  %s1235_s20 = scalar_lea.hbm %s1555_s23, 384 }
  0x3e   : > { %p1236_p12 = scmp.ne.s32.totalorder %s1555_s23, %s1235_s20  ;;  %s1240_s16 = scalar_lea.hbm %s1739_s0, 768 }
  0x3f   : > { %p1241_p6 = scmp.lt.u32.totalorder %s1555_s23, %s1739_s0  ;;  %p1242_p13 = scmp.lt.u32.totalorder %s1240_s16, %s1235_s20 }
  0x40   : > { %p1238_p1 = pnand %p1236_p12, %p1516_p4  ;;  %p1244_p5 = scmp.lt.u32.totalorder %s1235_s20, %s1555_s23 }
  0x41   : > { %p1243_p3 = por %p1242_p13, %p1241_p6 }
  0x42   : > { %p1239_p2 = pneg %p1238_p1 }
  0x43   : > { %p1245_p7 = por %p1244_p5, %p1243_p3 }
  0x45   : > { %p1246_p10 = pnand %p1245_p7, %p1239_p2 }
  0x47   : > { %1249 = shalt.err (!%p1246_p10)
}
  0x48   : > { %s1250_s30 = scalar_lea.vmem %s1558_s28, 384  ;;  %s1386_s6 = smov [#allocation6]  }
  0x49   : > { %p1251_p8 = scmp.ne.s32.totalorder %s1558_s28, %s1250_s30  ;;  %s1255_s8 = sshll.u32 %s1386_s6, 4  ;;  %s1256_s8 = int_to_ptr.vmem [resolvable:$false] %s1255_s8 }
  0x4a   : > { %s1257_s26 = scalar_lea.vmem %s1256_s8, 768  ;;  %p1258_p1 = scmp.lt.s32.totalorder %s1558_s28, %s1256_s8 }
  0x4b   : > { %p1253_p9 = pnand %p1251_p8, %p1516_p4  ;;  %p1259_p11 = scmp.lt.s32.totalorder %s1257_s26, %s1250_s30 }
  0x4d   : > { %p1254_p12 = pneg %p1253_p9  ;;  %p1260_p6 = por %p1259_p11, %p1258_p1 }
  0x4f   : > { %p1261_p13 = pnand %p1260_p6, %p1254_p12 }
  0x51   : > { %1264 = shalt.err (!%p1261_p13)
}
  0x52   : > { %s1767_s16 = smov 8   ;;  %s1768_s20 = smov 128  }
  0x53   : > { %1113 = dma.hbm_to_vmem [thread:$0]  (!%p1494_p0), %s1555_s23, 384, %s1558_s28, %s1568_s1, %s1768_s20, %s1768_s20, %s1767_s16  }
  0x54   : > { %s219_s10 = scalar_lea.vmem [#allocation11], %s1487_s29  ;;  %s1265_s22 = scalar_lea.hbm %s1564_s19, 384 }
  0x55   : > { %s227_s5 = sshll.u32 %s219_s10, 4  ;;  %p1266_p11 = scmp.ne.s32.totalorder %s1564_s19, %s1265_s22  ;;  %s1596_s5 = int_to_ptr.vmem [resolvable:$true] %s227_s5 }
  0x56   : > { %s1270_s6 = scalar_lea.hbm %s1741_s2, 768  ;;  %p1271_p5 = scmp.lt.u32.totalorder %s1564_s19, %s1741_s2 }
  0x57   : > { %p1268_p2 = pnand %p1266_p11, %p1516_p4  ;;  %p1272_p7 = scmp.lt.u32.totalorder %s1270_s6, %s1265_s22 }
  0x58   : > { %p1274_p8 = scmp.lt.u32.totalorder %s1265_s22, %s1564_s19 }
  0x59   : > { %p1269_p3 = pneg %p1268_p2  ;;  %p1273_p10 = por %p1272_p7, %p1271_p5 }
  0x5b   : > { %p1275_p9 = por %p1274_p8, %p1273_p10 }
  0x5d   : > { %p1276_p12 = pnand %p1275_p9, %p1269_p3 }
  0x5f   : > { %1279 = shalt.err (!%p1276_p12)
}
  0x60   : > { %s1280_s1 = scalar_lea.vmem %s1596_s5, 384  ;;  %s1387_s28 = smov [#allocation11]  }
  0x61   : > { %p1281_p1 = scmp.ne.s32.totalorder %s1596_s5, %s1280_s1  ;;  %s1285_s29 = sshll.u32 %s1387_s28, 4  ;;  %s1286_s29 = int_to_ptr.vmem [resolvable:$false] %s1285_s29 }
  0x62   : > { %s1287_s23 = scalar_lea.vmem %s1286_s29, 768  ;;  %p1288_p11 = scmp.lt.s32.totalorder %s1596_s5, %s1286_s29 }
  0x63   : > { %p1283_p6 = pnand %p1281_p1, %p1516_p4  ;;  %p1289_p2 = scmp.lt.s32.totalorder %s1287_s23, %s1280_s1 }
  0x65   : > { %p1284_p13 = pneg %p1283_p6  ;;  %p1290_p5 = por %p1289_p2, %p1288_p11 }
  0x67   : > { %p1291_p7 = pnand %p1290_p5, %p1284_p13 }
  0x69   : > { %1294 = shalt.err (!%p1291_p7)
}
  0x6a   : > { %1119 = dma.hbm_to_vmem [thread:$0]  (!%p1494_p0), %s1564_s19, 384, %s1596_s5, %s1510_s11, %s1768_s20, %s1768_s20, %s1767_s16  }
  0x6b   : > { %p1769_p4 = scmp.ne.s32.totalorder %s1765_s9, 0 }
  0x6c   : > { %s1626_s21 = sand.u32 (!%p1769_p4), 1, %s1365_s13   ;;  %p1770_p3 = scmp.ne.s32.totalorder (!%p1769_p4), %s1756_s24, 0 }
  0x6d   : > { %239 = sbr.rel (%p1769_p4) target bundleno = 1007 (0x3ef), region = 32  ;;  %s242_s4 = scalar_lea.sflag (!%p1769_p4), [#allocation7], %s1626_s21 }
  0x6e   : > { %s1629_s10 = smul.u32 (!%p1769_p4), 24, %s1626_s21 }
  0x70   : > { %s245_s22 = scalar_lea.vmem (!%p1769_p4), [#allocation6], %s1629_s10 }
  0x74   : > { %1348 = dma.done.wait (%p1770_p3), %s242_s4, 384  }
  0x75   : > { %1350 = vsyncadd (%p1770_p3), %s242_s4, 4294966912  ;;  %s250_s11 = sand.u32 1, %s1447_s18   ;;  %s254_s9 = scalar_lea.vmem [#allocation9], %s1629_s10 }
  0x76   : > { %s251_s19 = scalar_lea.sflag [#allocation10], %s250_s11 }
  0x77   : > { %1352 = dma.done.wait (%p1770_p3), %s251_s19, 768  }
  0x78   : > { %1354 = vsyncadd (%p1770_p3), %s251_s19, 4294966528  ;;  %v1388_v0 = vmov 0.0   ;;  %vm1389_vm0 = vmmov 0   ;;  %vm317_vm1 = vcmask 523264   ;;  %v324_v1 = vld [vmem:[%s254_s9] sm:$0xff]  ;;  %v311_v2 = vld [vmem:[%s245_s22] sm:$0xff] }
  0x79   : > { %1068 = vmatprep.subr.mxu0 %v1388_v0  ;;  %1070 = vmatprep.mubr.msk.f32.mxu0 %vm1389_vm0, %v1388_v0  ;;  %v325_v3 = vld [vmem:[%s254_s9 + $0x8] sm:$0xff]  ;;  %v314_v4 = vmul.f32 0.18033688, %v311_v2  ;;  %v312_v5 = vld [vmem:[%s245_s22 + $0x8] sm:$0xff]  ;;  %v313_v6 = vld [vmem:[%s245_s22 + $0x10] sm:$0xff]  ;;  %vm304_vm2 = vcmask 7168  }
  0x7a   : > { %1073 = vmatprep.subr.mxu1 %v1388_v0  ;;  %1075 = vmatprep.mubr.msk.f32.mxu1 %vm1389_vm0, %v1388_v0  ;;  %v315_v7 = vmul.f32 0.18033688, %v312_v5  ;;  %v316_v8 = vmul.f32 0.18033688, %v313_v6  ;;  %v326_v9 = vld [vmem:[%s254_s9 + $0x10] sm:$0xff]  ;;  %v1390_v13 = vmov -inf  }
  0x7b   : > { %1069 = vmatpush3.xpose.msk.msra.mxu0 %vm317_vm1, %v324_v1  ;;  %1074 = vmatpush3.xpose.msk.msra.mxu1 %vm317_vm1, %v325_v3  ;;  %318 = vst.msk [vmem:[#allocation5] sm:$0xff] %vm317_vm1, %v314_v4  ;;  %vm559_vm3 = vcmask 64512   ;;  %v1391_v23 = vmov 0   ;;  %s263_s18 = scalar_lea.vmem [#allocation11], %s1629_s10  ;;  %v1392_v51 = vmov 64   ;;  %s295_s24 = scalar_lea.vmem [#allocation12], %s1629_s10 }
  0x7c   : > { %1078 = vmatprep.subr.mxu0 %v1388_v0  ;;  %1083 = vmatprep.subr.mxu1 %v1388_v0  ;;  %319 = vst.msk [vmem:[#allocation5 + $0x8] sm:$0xff] %vm317_vm1, %v315_v7  ;;  %320 = vst.msk [vmem:[#allocation5 + $0x10] sm:$0xff] %vm317_vm1, %v316_v8  ;;  %v599_v36 = vld [vmem:[%s263_s18] sm:$0xff]  ;;  %v600_v38 = vld [vmem:[%s263_s18 + $0x8] sm:$0xff]  ;;  %s897_s16 = sshll.u32 %s295_s24, 4  ;;  %s1055_s20 = smul.u32 384, %s1373_s15  ;;  %s1685_s16 = int_to_ptr.vmem [resolvable:$true] %s897_s16 }
  0x7d   : > { %305 = vst.msk [vmem:[#allocation2] sm:$0xff] %vm304_vm2, %v1390_v13  ;;  %306 = vst.msk [vmem:[#allocation2 + $0x8] sm:$0xff] %vm304_vm2, %v1390_v13  ;;  %1183 = vset.pattern.permute.xlu1 %v1391_v23  ;;  %1184 = vset.pattern.permute.xlu0 %v1391_v23  ;;  %v601_v47 = vld [vmem:[%s263_s18 + $0x10] sm:$0xff]  ;;  %s883_s6 = scalar_lea.sflag [#allocation8], %s1626_s21  ;;  %s1295_s8 = scalar_lea.vmem %s1685_s16, 384 }
  0x7e   : > { %307 = vst.msk [vmem:[#allocation2 + $0x10] sm:$0xff] %vm304_vm2, %v1390_v13  ;;  %s1690_s30 = scalar_lea.hbm %s1742_s3, %s1055_s20  ;;  %p1296_p0 = scmp.ne.s32.totalorder %s1685_s16, %s1295_s8 }
  0x7f   : > { %p1771_p10 = scmp.ne.s32.totalorder %s1757_s25, 0  ;;  %s1393_s15 = smov [#allocation12]  }
  0x80   : > { %s1299_s26 = sshll.u32 %s1393_s15, 4  ;;  %s1300_s26 = int_to_ptr.vmem [resolvable:$false] %s1299_s26 }
  0x81   : > { %p1297_p8 = pnand %p1296_p0, %p1771_p10  ;;  %s1301_s1 = scalar_lea.vmem %s1300_s26, 768 }
  0x82   : > { %v321_v10 = vld [vmem:[#allocation5] sm:$0xff]  ;;  %p1302_p12 = scmp.lt.s32.totalorder %s1685_s16, %s1300_s26  ;;  %p1303_p1 = scmp.lt.s32.totalorder %s1301_s1, %s1295_s8 }
  0x83   : > { %1071 = vmatmul.mubr.msk.f32.vlgmr.msra.gmra.mrb[0].mxu0 %vm317_vm1, %v321_v10  ;;  %v322_v11 = vld [vmem:[#allocation5 + $0x8] sm:$0xff]  ;;  %v323_v12 = vld [vmem:[#allocation5 + $0x10] sm:$0xff]  ;;  %p1298_p9 = pneg %p1297_p8 }
  0x84   : > { %1079 = vmatpush3.xpose.msk.msra.mxu0 %vm317_vm1, %v326_v9  ;;  %1076 = vmatmul.mubr.msk.f32.vlgmr.msra.gmra.mrb[0].mxu1 %vm317_vm1, %v322_v11  ;;  %v556_v24 = vld [vmem:[#allocation2] sm:$0xff]  ;;  %v557_v27 = vld [vmem:[#allocation2 + $0x8] sm:$0xff]  ;;  %p1304_p6 = por %p1303_p1, %p1302_p12 }
  0x85   : > { %1080 = vmatprep.mubr.msk.f32.mxu0 %vm1389_vm0, %v1388_v0  ;;  %1085 = vmatprep.mubr.msk.f32.mxu1 %vm1389_vm0, %v1388_v0  ;;  %v558_v28 = vld [vmem:[#allocation2 + $0x10] sm:$0xff] }
  0x86   : > { %1088 = vmatprep.subr.mxu0 %v1388_v0  ;;  %1084 = vmatpush3.msra.mxu1 %v599_v36  ;;  %p1305_p13 = pnand %p1304_p6, %p1298_p9 }
  0x87   : > { %1081 = vmatmul.mubr.msk.f32.vlgmr.msra.gmra.mrb[2].mxu0 %vm317_vm1, %v323_v12  ;;  %1093 = vmatprep.subr.mxu1 %v1388_v0 }
  0x88   : > { %1090 = vmatprep.mubr.msk.f32.mxu0 %vm1389_vm0, %v1388_v0  ;;  %1089 = vmatpush3.msra.mxu0 %v600_v38 }
 0x156   : > { %v400_v14 = vpop.f32.mrb[0].mxu0 }
 0x157   : > { %v1072_v15 = vpop.f32.mrb[1].mxu0  ;;  %v560_v16 = vsel %vm559_vm3, %v400_v14, -inf  ;;  %v476_v17 = vpop.f32.mrb[0].mxu1 }
 0x158   : > { %561 = vmax.xlane.f32.xlu0 %v560_v16  ;;  %v1077_v18 = vpop.f32.mrb[1].mxu1  ;;  %v563_v19 = vsel %vm559_vm3, %v476_v17, -inf }
 0x15a   : > { %v552_v20 = vpop.f32.mrb[2].mxu0 }
 0x15b   : > { %v566_v21 = vsel %vm559_vm3, %v552_v20, -inf  ;;  %v1082_v22 = vpop.f32.mrb[3].mxu0 }
 0x15c   : > { %564 = vmax.xlane.f32.xlu0 %v563_v19  ;;  %567 = vmax.xlane.f32.xlu1 %v566_v21 }
 0x1e5   : > { %v562_v25 = vpop.xlane.xlu0 %561 }
 0x1e6   : > { %v569_v26 = vmax.f32 %v556_v24, %v562_v25 }
 0x1e8   : > { %v572_v29 = vsub.f32 %v556_v24, %v569_v26  ;;  %849 = vst.msk [vmem:[#allocation2] sm:$0xff] %vm304_vm2, %v569_v26  ;;  %580 = vperm.xlu1 %1183, %v569_v26  }
 0x1e9   : > { %v565_v30 = vpop.xlane.xlu0 %564  ;;  %v568_v31 = vpop.xlane.xlu1 %567 }
 0x1ea   : > { %1187 = vpow2.f32 %v572_v29  ;;  %v570_v32 = vmax.f32 %v557_v27, %v565_v30  ;;  %v571_v33 = vmax.f32 %v558_v28, %v568_v31 }
 0x1ec   : > { %v573_v34 = vsub.f32 %v557_v27, %v570_v32  ;;  %850 = vst.msk [vmem:[#allocation2 + $0x8] sm:$0xff] %vm304_vm2, %v570_v32  ;;  %v574_v35 = vsub.f32 %v558_v28, %v571_v33  ;;  %851 = vst.msk [vmem:[#allocation2 + $0x10] sm:$0xff] %vm304_vm2, %v571_v33  ;;  %585 = vperm.xlu0 %1184, %v570_v32   ;;  %590 = vperm.xlu1 %1183, %v571_v33  }
 0x1ee   : > { %1189 = vpow2.f32 %v573_v34 }
 0x1ef   : > { %1191 = vpow2.f32 %v574_v35 }
 0x1f0   : > { %1186 = vset.pattern.permute.xlu0 %v1392_v51 }
 0x1f4   : > { %v1188_v37 = vpop.eup %1187 }
 0x1f5   : > { %826 = vperm.xlu1 %1183, %v1188_v37  }
 0x1f8   : > { %v1190_v39 = vpop.eup %1189 }
 0x1f9   : > { %831 = vperm.xlu1 %1183, %v1190_v39   ;;  %v1192_v40 = vpop.eup %1191 }
 0x1fd   : > { %836 = vperm.xlu1 %1183, %v1192_v40  }
 0x201   : > { %1185 = vset.pattern.permute.xlu1 %v1392_v51 }
 0x267   : > { %v581_v41 = vpop.permute.xlu1 %580 }
 0x268   : > { %v593_v42 = vsub.f32 %v400_v14, %v581_v41 }
 0x26a   : > { %1193 = vpow2.f32 %v593_v42 }
 0x26b   : > { %v586_v43 = vpop.permute.xlu0 %585  ;;  %v591_v44 = vpop.permute.xlu1 %590 }
 0x26c   : > { %v594_v45 = vsub.f32 %v476_v17, %v586_v43  ;;  %v595_v46 = vsub.f32 %v552_v20, %v591_v44 }
 0x26e   : > { %1195 = vpow2.f32 %v594_v45 }
 0x26f   : > { %1197 = vpow2.f32 %v595_v46 }
 0x274   : > { %v1194_v48 = vpop.eup %1193  ;;  %v827_v52 = vpop.permute.xlu1 %826 }
 0x275   : > { %1086 = vmatmul.mubr.msk.f32.vlgmr.msra.gmra.mrb[2].mxu1 %vm559_vm3, %v1194_v48  ;;  %v839_v54 = vmul.f32 0.0, %v827_v52 }
 0x276   : > { %1094 = vmatpush3.msra.mxu1 %v601_v47  ;;  %1095 = vmatprep.mubr.msk.f32.mxu1 %vm1389_vm0, %v1388_v0 }
 0x278   : > { %v1196_v49 = vpop.eup %1195  ;;  %v832_v53 = vpop.permute.xlu1 %831 }
 0x279   : > { %v1198_v50 = vpop.eup %1197  ;;  %1091 = vmatmul.mubr.msk.f32.vlgmr.msra.gmra.mrb[4].mxu0 %vm559_vm3, %v1196_v49  ;;  %v840_v59 = vmul.f32 0.0, %v832_v53 }
 0x27a   : > { %1096 = vmatmul.mubr.msk.f32.vlgmr.msra.gmra.mrb[4].mxu1 %vm559_vm3, %v1198_v50 }
 0x27c   : > { %v837_v58 = vpop.permute.xlu1 %836 }
 0x27d   : > { %v841_v61 = vmul.f32 0.0, %v837_v58 }
 0x348   : > { %v671_v55 = vpop.f32.mrb[2].mxu1 }
 0x349   : > { %v842_v56 = vadd.f32 %v839_v54, %v671_v55  ;;  %v1087_v57 = vpop.f32.mrb[3].mxu1 }
 0x34b   : > { %1199 = vrcp.f32 %v842_v56 }
 0x34c   : > { %v744_v60 = vpop.f32.mrb[4].mxu0 }
 0x34d   : > { %v843_v62 = vadd.f32 %v840_v59, %v744_v60  ;;  %v817_v63 = vpop.f32.mrb[4].mxu1  ;;  %v1092_v0 = vpop.f32.mrb[5].mxu0 }
 0x34e   : > { %v1097_v1 = vpop.f32.mrb[5].mxu1  ;;  %v844_v2 = vadd.f32 %v841_v61, %v817_v63 }
 0x34f   : > { %1201 = vrcp.f32 %v843_v62 }
 0x350   : > { %1203 = vrcp.f32 %v844_v2 }
 0x355   : > { %v1200_v3 = vpop.eup %1199 }
 0x356   : > { %863 = vperm.xlu1 %1185, %v1200_v3  }
 0x359   : > { %v1202_v4 = vpop.eup %1201 }
 0x35a   : > { %868 = vperm.xlu1 %1185, %v1202_v4   ;;  %v1204_v5 = vpop.eup %1203 }
 0x35e   : > { %873 = vperm.xlu1 %1185, %v1204_v5  }
 0x3d5   : > { %v864_v6 = vpop.permute.xlu1 %863 }
 0x3d6   : > { %v876_v7 = vmul.f32 %v864_v6, %v842_v56 }
 0x3d8   : > { %879 = vst [vmem:[%s295_s24] sm:$0xff] %v876_v7 }
 0x3d9   : > { %v869_v8 = vpop.permute.xlu1 %868 }
 0x3da   : > { %v877_v9 = vmul.f32 %v869_v8, %v843_v62 }
 0x3dc   : > { %880 = vst [vmem:[%s295_s24 + $0x8] sm:$0xff] %v877_v9 }
 0x3dd   : > { %v874_v10 = vpop.permute.xlu1 %873 }
 0x3de   : > { %v878_v11 = vmul.f32 %v874_v10, %v844_v2 }
 0x3e0   : > { %881 = vst [vmem:[%s295_s24 + $0x10] sm:$0xff] %v878_v11 }
 0x3e1   : > { %1308 = shalt.err (!%p1305_p13)
}
 0x3e2   : > { %s1309_s28 = scalar_lea.hbm %s1690_s30, 384  ;;  %s1313_s10 = scalar_lea.hbm %s1742_s3, 768 }
 0x3e3   : > { %p1310_p11 = scmp.ne.s32.totalorder %s1690_s30, %s1309_s28  ;;  %p1314_p7 = scmp.lt.u32.totalorder %s1690_s30, %s1742_s3 }
 0x3e4   : > { %p1315_p4 = scmp.lt.u32.totalorder %s1313_s10, %s1309_s28  ;;  %p1317_p0 = scmp.lt.u32.totalorder %s1309_s28, %s1690_s30 }
 0x3e5   : > { %p1311_p2 = pnand %p1310_p11, %p1771_p10 }
 0x3e6   : > { %p1316_p3 = por %p1315_p4, %p1314_p7 }
 0x3e7   : > { %p1312_p5 = pneg %p1311_p2 }
 0x3e8   : > { %p1318_p8 = por %p1317_p0, %p1316_p3 }
 0x3ea   : > { %p1319_p9 = pnand %p1318_p8, %p1312_p5 }
 0x3ec   : > { %1322 = shalt.err (!%p1319_p9)
}
 0x3ed   : > { %s1394_s11 = smov 128   ;;  %s1395_s19 = smov 8  }
 0x3ee   : > { %1108 = dma.vmem_to_hbm [thread:$0]  (%p1771_p10), %s1685_s16, 384, %s1690_s30, %s883_s6, %s1394_s11, %s1394_s11, %s1395_s19  }
 0x3ef PF: > { %s912_s9 = sand.u32 1, %s1361_s12   ;;  %p1772_p12 = scmp.ne.s32.totalorder %s1759_s27, 0 }
 0x3f0   : > { %p1773_p1 = scmp.ge.s32.totalorder %s1381_s17, 2  ;;  %s913_s18 = scalar_lea.sflag [#allocation8], %s912_s9 }
 0x3f2   : > { %p1121_p6 = pnand %p1773_p1, %p1772_p12 }
 0x3f4   : > { %1356 = dma.done.wait (!%p1121_p6), %s913_s18, 384  }
 0x3f5   : > { %1358 = vsyncadd (!%p1121_p6), %s913_s18, 4294966912  ;;  %s22_s17 = sadd.s32 1, %s1381_s17   ;;  %s1774_s24 = sld [smem:[#allocation18_spill]] }
 0x3f6   : > { %p19_p13 = scmp.ge.s32.totalorder %s22_s17, 4   ;;  %s1775_s15 = sld [smem:[#allocation16_spill]] }
 0x3f7   : > { %s1776_s16 = sld [smem:[#allocation17_spill]]  ;;  %s1777_s12 = smov %s1365_s13 }
 0x3f8   : > { %s1778_s13 = smov %s1369_s14  ;;  %21 = sbr.rel (!%p19_p13) target bundleno = 10 (0xa), region = 109 }
 0x3fb   : > { %s1779_s14 = smov %s1774_s24 }
 0x3ff   :  { %918 = vsyncpa [#allocation7], 1 }
 0x400   :  { %920 = vsyncpa [#allocation7 + $0x1], 1 }
 0x401   :  { %921 = vsyncpa [#allocation10], 1 }
 0x402   :  { %923 = vsyncpa [#allocation10 + $0x1], 1 }
 0x403   :  { %924 = vsyncpa [#allocation8], 1 }
 0x404   :  { %926 = vsyncpa [#allocation8 + $0x1], 1 }

</bundles_post_ra>
